<compile_context>
chip_gen: v7x
topology: tpu7x:2x2x1
jax: 0.10.0
libtpu: 0.0.40
codegen_flags: <defaults>
</compile_context>

<pallas_src>
import functools

import jax
import jax.numpy as jnp
from jax.experimental import pallas as pl
from jax.experimental.pallas import tpu as pltpu


# ----------------------------------------------------------------------------
# Model hyper-parameters (small, consistent with the module's __init__)
# ----------------------------------------------------------------------------
BATCH = 2
IMG_C, IMG_H, IMG_W = 3, 64, 64
BACKBONE_INIT_DIM = 16      # backbone_init_dim
MASK_DIM = 32               # mask_dim
QUERY_DIM = 32              # query_dim
HIDDEN_DIM = QUERY_DIM * 4  # MLP hidden = query_dim * 4 = 128
N_QUERY = 8
NUM_CLASSES = 5
H0, W0 = 16, 16             # spatial size of backbone feature x[0]
H1, W1 = 8, 8               # spatial size of encoder feature (x[0] / 2)
BN_EPS = 1e-5


# ----------------------------------------------------------------------------
# Fused Pallas kernel: channels-major feature branch + MLP + per-batch einsum
# ----------------------------------------------------------------------------
def _mask_head_kernel(featin_ref, q_ref,
                      wcomb_ref, bc_ref,                  # folded conv/BN chain
                      wm1_ref, bm1_ref,                   # mask_embed layer 0
                      wm2_ref, bm2_ref,                   # mask_embed layer 1
                      wm3_ref, bm3_ref,                   # mask_embed layer 2
                      out_ref):
    f32 = jnp.float32
    bf16 = jnp.bfloat16

    # ---- feature branch (channels-major, token axis on lanes) --------------
    # featsT = relu( [W1f^T | W2f^T] @ [xb^T ; xe_up^T] + b_comb^T )
    featsT = jnp.dot(wcomb_ref[...], featin_ref[...],
                     preferred_element_type=f32)                     # (Cm, B*HW) f32
    featsT = jnp.maximum(featsT + bc_ref[...], 0.0).astype(bf16)     # single bf16 round

    # ---- mask_embed MLP on the batch-fused queries --------------------------
    h = jnp.dot(q_ref[...], wm1_ref[...], preferred_element_type=f32) + bm1_ref[...]
    h = jnp.maximum(h, 0.0).astype(bf16)
    h = jnp.dot(h, wm2_ref[...], preferred_element_type=f32) + bm2_ref[...]
    h = jnp.maximum(h, 0.0).astype(bf16)
    emb = jnp.dot(h, wm3_ref[...], preferred_element_type=f32) + bm3_ref[...]  # (B*Q, Cm) f32
    emb = emb.astype(bf16)                                            # single bf16 round

    # ---- per-batch 'qc,cp->qp': lane-aligned column slices of featsT --------
    hw = out_ref.shape[1]                 # 256  (lane-aligned slices)
    bsz = featsT.shape[1] // hw           # batch
    nq = out_ref.shape[0] // bsz          # queries per batch
    for b in range(bsz):                  # static unroll, batch is tiny
        out_ref[b * nq:(b + 1) * nq, :] = jnp.dot(
            emb[b * nq:(b + 1) * nq, :], featsT[:, b * hw:(b + 1) * hw],
            preferred_element_type=f32)


def mask_head_pallas(feat_in, q_all, kp, *, batch):
    """feat_in: (Cb+Cm, B*HW) bf16 channels-major concat of backbone + upsampled
    encoder tokens ; q_all: (B*Q, Cq) bf16."""
    K, BT = feat_in.shape
    Rq, Cq = q_all.shape
    Cm = kp["wcomb"].shape[0]
    Hd = kp["wm1"].shape[1]
    HW = BT // batch

    def full(shape):
        return pl.BlockSpec(shape, lambda i: (0, 0))

    grid_spec = pltpu.PrefetchScalarGridSpec(
        num_scalar_prefetch=0,
        grid=(1,),                                 # batch fused -> single grid step
        in_specs=[
            full((K, BT)),                         # [xb^T ; xe_up^T] channels-major
            full((Rq, Cq)),                        # queries (batch-fused)
            full((Cm, K)), full((Cm, 1)),          # Wcomb^T, b_comb^T
            full((Cq, Hd)), full((1, Hd)),         # mlp layer 0
            full((Hd, Hd)), full((1, Hd)),         # mlp layer 1
            full((Hd, Cm)), full((1, Cm)),         # mlp layer 2
        ],
        out_specs=full((Rq, HW)),                  # lane-dense (B*Q, HW=256) output
    )
    return pl.pallas_call(
        _mask_head_kernel,
        out_shape=jax.ShapeDtypeStruct((Rq, HW), jnp.float32),
        grid_spec=grid_spec,
        compiler_params=pltpu.CompilerParams(dimension_semantics=("arbitrary",)),
    )(feat_in, q_all, kp["wcomb"], kp["bc"],
      kp["wm1"], kp["bm1"], kp["wm2"], kp["bm2"], kp["wm3"], kp["bm3"])


# ----------------------------------------------------------------------------
# Plain-JAX glue / parameter preparation
# ----------------------------------------------------------------------------
def fold_conv_bn(w, b, gamma, beta, mean, var, eps=BN_EPS):
    """Fold Conv1x1 (w: (Cout, Cin), b: (Cout,)) + eval-mode BatchNorm into a
    single matmul weight (Cin, Cout) and bias (1, Cout)."""
    scale = gamma / jnp.sqrt(var + eps)
    w_f = (w * scale[:, None]).T          # (Cin, Cout)
    b_f = (b - mean) * scale + beta       # (Cout,)
    return w_f.astype(jnp.float32), b_f[None, :].astype(jnp.float32)


def upsample2x_bilinear_nhwc(x):
    """2x bilinear upsample (align_corners=False, half-pixel, edge clamped),
    NHWC.  Matches torch F.interpolate(scale_factor=2, mode='bilinear',
    align_corners=False): even rows = 0.25*prev + 0.75*cur, odd = 0.75*cur +
    0.25*next."""
    def up_axis(a, axis):
        n = a.shape[axis]
        idx = jnp.arange(n)
        a_prev = jnp.take(a, jnp.clip(idx - 1, 0, n - 1), axis=axis)
        a_next = jnp.take(a, jnp.clip(idx + 1, 0, n - 1), axis=axis)
        even = 0.25 * a_prev + 0.75 * a
        odd = 0.75 * a + 0.25 * a_next
        stacked = jnp.stack([even, odd], axis=axis + 1)
        new_shape = list(a.shape)
        new_shape[axis] = 2 * n
        return stacked.reshape(new_shape)
    return up_axis(up_axis(x, 1), 2)


def avg_pool_nchw(x, k):
    B, C, H, W = x.shape
    return x.reshape(B, C, H // k, k, W // k, k).mean(axis=(3, 5))


def init_params(key):
    ks = jax.random.split(key, 20)
    p = {}

    # --- RMDETR-owned parameters (Conv1x1 + BatchNorm folded for eval) ------
    def conv_bn(kw, kb, kk, cin, cout):
        w = 0.1 * jax.random.normal(kw, (cout, cin), jnp.float32)
        b = 0.05 * jax.random.normal(kb, (cout,), jnp.float32)
        gamma = 1.0 + 0.1 * jax.random.normal(kk, (cout,), jnp.float32)
        beta = 0.02 * jnp.arange(cout, dtype=jnp.float32) / cout
        mean = 0.01 * jnp.arange(cout, dtype=jnp.float32) / cout
        var = 1.0 + 0.1 * (jnp.arange(cout, dtype=jnp.float32) / cout)
        return fold_conv_bn(w, b, gamma, beta, mean, var)

    p["w1"], p["b1"] = conv_bn(ks[0], ks[1], ks[2], BACKBONE_INIT_DIM, MASK_DIM)
    p["w2"], p["b2"] = conv_bn(ks[3], ks[4], ks[5], MASK_DIM, MASK_DIM)
    p["wf"], p["bf"] = conv_bn(ks[6], ks[7], ks[8], MASK_DIM, MASK_DIM)

    # mask_embed = MLP(query_dim, query_dim*4, mask_dim, num_layers=3)
    p["wm1"] = 0.1 * jax.random.normal(ks[9], (QUERY_DIM, HIDDEN_DIM), jnp.float32)
    p["bm1"] = jnp.zeros((1, HIDDEN_DIM), jnp.float32)
    p["wm2"] = 0.1 * jax.random.normal(ks[10], (HIDDEN_DIM, HIDDEN_DIM), jnp.float32)
    p["bm2"] = jnp.zeros((1, HIDDEN_DIM), jnp.float32)
    p["wm3"] = 0.1 * jax.random.normal(ks[11], (HIDDEN_DIM, MASK_DIM), jnp.float32)
    p["bm3"] = jnp.zeros((1, MASK_DIM), jnp.float32)

    # --- stub parameters for the injected backbone / encoder / decoder ------
    # TODO(synk): backbone/encoder/decoder are __inject__'ed external modules;
    # replaced by deterministic lightweight stubs producing correct shapes.
    p["wb0"] = 0.2 * jax.random.normal(ks[12], (IMG_C, BACKBONE_INIT_DIM), jnp.float32)
    p["wb1"] = 0.2 * jax.random.normal(ks[13], (IMG_C, MASK_DIM), jnp.float32)
    p["wenc"] = 0.2 * jax.random.normal(ks[14], (MASK_DIM, MASK_DIM), jnp.float32)
    p["wbox"] = 0.2 * jax.random.normal(ks[15], (QUERY_DIM, 4), jnp.float32)
    p["wcls"] = 0.2 * jax.random.normal(ks[16], (QUERY_DIM, NUM_CLASSES), jnp.float32)
    return p


def prepare_mask_kernel_params(p):
    """Host-side algebraic folds + bf16 casts for the fused kernel.

    Fold valid because m1/m2 are Conv+BN with NO nonlinearity before fconv:
        feats = relu( xb@W1f + up(xe)@W2f + b_comb )
    and the two feature matmuls are stacked along K into one weight."""
    W1f = p["w1"] @ p["wf"]                                   # (Cb, Cm)
    W2f = p["w2"] @ p["wf"]                                   # (Cm, Cm)
    b_comb = (p["b1"] + p["b2"]) @ p["wf"] + p["bf"]          # (1, Cm)

    wcomb_T = jnp.concatenate([W1f.T, W2f.T], axis=1)         # (Cm, Cb+Cm) = (32, 48)
    bc_T = b_comb.T                                           # (Cm, 1)

    bf16 = jnp.bfloat16
    return dict(
        wcomb=wcomb_T.astype(bf16), bc=bc_T.astype(jnp.float32),
        wm1=p["wm1"].astype(bf16), bm1=p["bm1"],
        wm2=p["wm2"].astype(bf16), bm2=p["bm2"],
        wm3=p["wm3"].astype(bf16), bm3=p["bm3"],
    )


def _stub_features(p, x):
    """Backbone / encoder / decoder stubs, emitted directly channels-last
    (B, HW, C) so no separate NCHW->NHWC transpose ops are needed."""
    B = x.shape[0]
    p0 = avg_pool_nchw(x, IMG_H // H0).reshape(B, IMG_C, H0 * W0)     # (B, 3, 256)
    xb_tok = jnp.einsum("bcp,cd->bpd", p0, p["wb0"])                  # (B, 256, 16)
    p1 = avg_pool_nchw(x, IMG_H // H1).reshape(B, IMG_C, H1 * W1)     # (B, 3, 64)
    f1_tok = jnp.einsum("bcp,cd->bpd", p1, p["wb1"])                  # (B, 64, 32)
    enc_tok = jnp.einsum("bpc,cd->bpd", f1_tok, p["wenc"])            # (B, 64, 32) = encoder_out[0]

    # decoder stub: queries from the first N_QUERY encoder tokens
    query = enc_tok[:, :N_QUERY, :]                                   # (B, 8, 32)
    pred_boxes = jax.nn.sigmoid(query @ p["wbox"])                    # (B, 8, 4)
    pred_logits = query @ p["wcls"]                                   # (B, 8, 5)
    return xb_tok, enc_tok, query, pred_logits, pred_boxes


def rmdetr_forward(params, kern_params, x):
    """Inference forward of RMDETR (multi_scale branch is training-only)."""
    B = x.shape[0]
    xb_tok, enc_tok, query, pred_logits, pred_boxes = _stub_features(params, x)
    output = {"pred_logits": pred_logits, "pred_boxes": pred_boxes}

    # ---- get_mask (fused Pallas hot path) -----------------------------------
    n_query = pred_boxes.shape[1]
    q_in = query[:, -n_query:, :]                                      # out_query[-1][:, -n:, :]
    bf16 = jnp.bfloat16

    # 2x bilinear upsample of the tiny encoder feature in the wrapper (f32),
    # then channels-major layout: long token axis (B*HW) on lanes.
    xe_img = enc_tok.reshape(B, H1, W1, MASK_DIM)
    xe_up = upsample2x_bilinear_nhwc(xe_img).reshape(B, H0 * W0, MASK_DIM)   # (B, 256, 32)

    xb_T = jnp.transpose(xb_tok, (2, 0, 1)).reshape(BACKBONE_INIT_DIM, B * H0 * W0)
    xe_T = jnp.transpose(xe_up, (2, 0, 1)).reshape(MASK_DIM, B * H0 * W0)
    feat_in = jnp.concatenate([xb_T, xe_T], axis=0).astype(bf16)             # (48, B*256)

    q_all = q_in.reshape(B * n_query, QUERY_DIM).astype(bf16)                # (B*Q, 32)

    mask_flat = mask_head_pallas(feat_in, q_all, kern_params, batch=B)       # (B*Q, HW)
    output["pred_masks"] = mask_flat.reshape(B, n_query, H0, W0)             # 'bqhw'
    return output


def get_mask_reference(p, xb_tok, enc_tok, q_in):
    """Unfused f32 reference of the original get_mask (for validation)."""
    B = xb_tok.shape[0]
    xe_img = enc_tok.reshape(B, H1, W1, MASK_DIM)
    xe_up = upsample2x_bilinear_nhwc(xe_img).reshape(B, H0 * W0, MASK_DIM)
    m1 = xb_tok @ p["w1"] + p["b1"]
    m2 = xe_up @ p["w2"] + p["b2"]
    feats = jax.nn.relu((m1 + m2) @ p["wf"] + p["bf"])                 # (B, HW, Cm)
    h = jax.nn.relu(q_in @ p["wm1"] + p["bm1"])
    h = jax.nn.relu(h @ p["wm2"] + p["bm2"])
    emb = h @ p["wm3"] + p["bm3"]                                      # (B, Q, Cm)
    mask = jnp.einsum("bqc,bpc->bqp", emb, feats)                      # (B, Q, HW)
    return mask.reshape(B, -1, H0, W0)


# ----------------------------------------------------------------------------
if __name__ == "__main__":
    key = jax.random.PRNGKey(0)
    k_param, k_x = jax.random.split(key)
    params = init_params(k_param)
    kern_params = prepare_mask_kernel_params(params)
    x = jax.random.normal(k_x, (BATCH, IMG_C, IMG_H, IMG_W), jnp.float32)

    fwd = jax.jit(functools.partial(rmdetr_forward, params, kern_params))
    out = fwd(x)
    jax.block_until_ready(out)

    assert out["pred_masks"].shape == (BATCH, N_QUERY, H0, W0)
    assert out["pred_boxes"].shape == (BATCH, N_QUERY, 4)
    assert jnp.all(jnp.isfinite(out["pred_masks"]))

    # validate the algebraic fold + channels-major bf16 path against the
    # unfused f32 reference (bf16 operand rounding -> loose tolerance)
    xb_tok, enc_tok, query, _, _ = _stub_features(params, x)
    ref_mask = get_mask_reference(params, xb_tok, enc_tok, query)
    rel_err = jnp.max(jnp.abs(out["pred_masks"] - ref_mask)) / (
        jnp.max(jnp.abs(ref_mask)) + 1e-6)
    assert float(rel_err) < 0.05, f"pred_masks mismatch: rel err {float(rel_err)}"

    print("KERNEL_OK")
</pallas_src>

<mosaic_0001>
module attributes {stable_mosaic.version = 11 : i64} {
  func.func @_mask_head_kernel(%arg0: i32, %arg1: memref<48x512xbf16, #tpu.memory_space<vmem>>, %arg2: memref<16x32xbf16, #tpu.memory_space<vmem>>, %arg3: memref<32x48xbf16, #tpu.memory_space<vmem>>, %arg4: memref<32x1xf32, #tpu.memory_space<vmem>>, %arg5: memref<32x128xbf16, #tpu.memory_space<vmem>>, %arg6: memref<1x128xf32, #tpu.memory_space<vmem>>, %arg7: memref<128x128xbf16, #tpu.memory_space<vmem>>, %arg8: memref<1x128xf32, #tpu.memory_space<vmem>>, %arg9: memref<128x32xbf16, #tpu.memory_space<vmem>>, %arg10: memref<1x32xf32, #tpu.memory_space<vmem>>, %arg11: memref<16x256xf32, #tpu.memory_space<vmem>>) attributes {dimension_semantics = [#tpu.dimension_semantics<arbitrary>], iteration_bounds = array<i64: 1>, scalar_prefetch = 0 : i64, scratch_operands = 0 : i64, tpu.core_type = #tpu.core_type<tc>, window_params = [{pipeline_mode = #tpu.pipeline_mode<synchronous>, transform_indices = @transform_0, window_bounds = array<i64: 48, 512>}, {pipeline_mode = #tpu.pipeline_mode<synchronous>, transform_indices = @transform_1, window_bounds = array<i64: 16, 32>}, {pipeline_mode = #tpu.pipeline_mode<synchronous>, transform_indices = @transform_2, window_bounds = array<i64: 32, 48>}, {pipeline_mode = #tpu.pipeline_mode<synchronous>, transform_indices = @transform_3, window_bounds = array<i64: 32, 1>}, {pipeline_mode = #tpu.pipeline_mode<synchronous>, transform_indices = @transform_4, window_bounds = array<i64: 32, 128>}, {pipeline_mode = #tpu.pipeline_mode<synchronous>, transform_indices = @transform_5, window_bounds = array<i64: 1, 128>}, {pipeline_mode = #tpu.pipeline_mode<synchronous>, transform_indices = @transform_6, window_bounds = array<i64: 128, 128>}, {pipeline_mode = #tpu.pipeline_mode<synchronous>, transform_indices = @transform_7, window_bounds = array<i64: 1, 128>}, {pipeline_mode = #tpu.pipeline_mode<synchronous>, transform_indices = @transform_8, window_bounds = array<i64: 128, 32>}, {pipeline_mode = #tpu.pipeline_mode<synchronous>, transform_indices = @transform_9, window_bounds = array<i64: 1, 32>}, {pipeline_mode = #tpu.pipeline_mode<synchronous>, transform_indices = @transform_10, window_bounds = array<i64: 16, 256>}]} {
    %c0 = arith.constant 0 : index
    %c0_0 = arith.constant 0 : index
    %0 = vector.load %arg3[%c0, %c0_0] : memref<32x48xbf16, #tpu.memory_space<vmem>>, vector<32x48xbf16>
    %c0_1 = arith.constant 0 : index
    %c0_2 = arith.constant 0 : index
    %1 = vector.load %arg1[%c0_1, %c0_2] : memref<48x512xbf16, #tpu.memory_space<vmem>>, vector<48x512xbf16>
    %cst = arith.constant dense<0.000000e+00> : vector<32x512xf32>
    %2 = tpu.matmul %0, %1, %cst {dimension_numbers = #tpu.dot_dimension_numbers<[1], [0], [0], [1], [0, 0, 1, 1], [], []>} : vector<32x48xbf16>, vector<48x512xbf16>, vector<32x512xf32> -> vector<32x512xf32>
    %c0_3 = arith.constant 0 : index
    %c0_4 = arith.constant 0 : index
    %3 = vector.load %arg4[%c0_3, %c0_4] : memref<32x1xf32, #tpu.memory_space<vmem>>, vector<32x1xf32>
    %4 = vector.broadcast %3 : vector<32x1xf32> to vector<32x512xf32>
    %5 = arith.addf %2, %4 : vector<32x512xf32>
    %cst_5 = arith.constant 0.000000e+00 : f32
    %6 = vector.broadcast %cst_5 : f32 to vector<32x512xf32>
    %7 = arith.maximumf %5, %6 : vector<32x512xf32>
    %8 = arith.truncf %7 : vector<32x512xf32> to vector<32x512xbf16>
    %c0_6 = arith.constant 0 : index
    %c0_7 = arith.constant 0 : index
    %9 = vector.load %arg2[%c0_6, %c0_7] : memref<16x32xbf16, #tpu.memory_space<vmem>>, vector<16x32xbf16>
    %c0_8 = arith.constant 0 : index
    %c0_9 = arith.constant 0 : index
    %10 = vector.load %arg5[%c0_8, %c0_9] : memref<32x128xbf16, #tpu.memory_space<vmem>>, vector<32x128xbf16>
    %cst_10 = arith.constant dense<0.000000e+00> : vector<16x128xf32>
    %11 = tpu.matmul %9, %10, %cst_10 {dimension_numbers = #tpu.dot_dimension_numbers<[1], [0], [0], [1], [0, 0, 1, 1], [], []>} : vector<16x32xbf16>, vector<32x128xbf16>, vector<16x128xf32> -> vector<16x128xf32>
    %c0_11 = arith.constant 0 : index
    %c0_12 = arith.constant 0 : index
    %12 = vector.load %arg6[%c0_11, %c0_12] : memref<1x128xf32, #tpu.memory_space<vmem>>, vector<1x128xf32>
    %13 = vector.broadcast %12 : vector<1x128xf32> to vector<16x128xf32>
    %14 = arith.addf %11, %13 : vector<16x128xf32>
    %cst_13 = arith.constant 0.000000e+00 : f32
    %15 = vector.broadcast %cst_13 : f32 to vector<16x128xf32>
    %16 = arith.maximumf %14, %15 : vector<16x128xf32>
    %17 = arith.truncf %16 : vector<16x128xf32> to vector<16x128xbf16>
    %c0_14 = arith.constant 0 : index
    %c0_15 = arith.constant 0 : index
    %18 = vector.load %arg7[%c0_14, %c0_15] : memref<128x128xbf16, #tpu.memory_space<vmem>>, vector<128x128xbf16>
    %cst_16 = arith.constant dense<0.000000e+00> : vector<16x128xf32>
    %19 = tpu.matmul %17, %18, %cst_16 {dimension_numbers = #tpu.dot_dimension_numbers<[1], [0], [0], [1], [0, 0, 1, 1], [], []>} : vector<16x128xbf16>, vector<128x128xbf16>, vector<16x128xf32> -> vector<16x128xf32>
    %c0_17 = arith.constant 0 : index
    %c0_18 = arith.constant 0 : index
    %20 = vector.load %arg8[%c0_17, %c0_18] : memref<1x128xf32, #tpu.memory_space<vmem>>, vector<1x128xf32>
    %21 = vector.broadcast %20 : vector<1x128xf32> to vector<16x128xf32>
    %22 = arith.addf %19, %21 : vector<16x128xf32>
    %cst_19 = arith.constant 0.000000e+00 : f32
    %23 = vector.broadcast %cst_19 : f32 to vector<16x128xf32>
    %24 = arith.maximumf %22, %23 : vector<16x128xf32>
    %25 = arith.truncf %24 : vector<16x128xf32> to vector<16x128xbf16>
    %c0_20 = arith.constant 0 : index
    %c0_21 = arith.constant 0 : index
    %26 = vector.load %arg9[%c0_20, %c0_21] : memref<128x32xbf16, #tpu.memory_space<vmem>>, vector<128x32xbf16>
    %cst_22 = arith.constant dense<0.000000e+00> : vector<16x32xf32>
    %27 = tpu.matmul %25, %26, %cst_22 {dimension_numbers = #tpu.dot_dimension_numbers<[1], [0], [0], [1], [0, 0, 1, 1], [], []>} : vector<16x128xbf16>, vector<128x32xbf16>, vector<16x32xf32> -> vector<16x32xf32>
    %c0_23 = arith.constant 0 : index
    %c0_24 = arith.constant 0 : index
    %28 = vector.load %arg10[%c0_23, %c0_24] : memref<1x32xf32, #tpu.memory_space<vmem>>, vector<1x32xf32>
    %29 = vector.broadcast %28 : vector<1x32xf32> to vector<16x32xf32>
    %30 = arith.addf %27, %29 : vector<16x32xf32>
    %31 = arith.truncf %30 : vector<16x32xf32> to vector<16x32xbf16>
    %32 = vector.extract_strided_slice %31 {offsets = [0, 0], sizes = [8, 32], strides = [1, 1]} : vector<16x32xbf16> to vector<8x32xbf16>
    %33 = vector.extract_strided_slice %8 {offsets = [0, 0], sizes = [32, 256], strides = [1, 1]} : vector<32x512xbf16> to vector<32x256xbf16>
    %cst_25 = arith.constant dense<0.000000e+00> : vector<8x256xf32>
    %34 = tpu.matmul %32, %33, %cst_25 {dimension_numbers = #tpu.dot_dimension_numbers<[1], [0], [0], [1], [0, 0, 1, 1], [], []>} : vector<8x32xbf16>, vector<32x256xbf16>, vector<8x256xf32> -> vector<8x256xf32>
    %c0_26 = arith.constant 0 : index
    %c0_27 = arith.constant 0 : index
    %35 = vector.load %arg11[%c0_26, %c0_27] : memref<16x256xf32, #tpu.memory_space<vmem>>, vector<8x256xf32>
    tpu.vector_store %arg11[%c0_26, %c0_27], %34 {strides = array<i32>} : memref<16x256xf32, #tpu.memory_space<vmem>>, vector<8x256xf32>,
    %36 = vector.extract_strided_slice %31 {offsets = [8, 0], sizes = [8, 32], strides = [1, 1]} : vector<16x32xbf16> to vector<8x32xbf16>
    %37 = vector.extract_strided_slice %8 {offsets = [0, 256], sizes = [32, 256], strides = [1, 1]} : vector<32x512xbf16> to vector<32x256xbf16>
    %cst_28 = arith.constant dense<0.000000e+00> : vector<8x256xf32>
    %38 = tpu.matmul %36, %37, %cst_28 {dimension_numbers = #tpu.dot_dimension_numbers<[1], [0], [0], [1], [0, 0, 1, 1], [], []>} : vector<8x32xbf16>, vector<32x256xbf16>, vector<8x256xf32> -> vector<8x256xf32>
    %c8 = arith.constant 8 : index
    %c0_29 = arith.constant 0 : index
    %39 = vector.load %arg11[%c8, %c0_29] : memref<16x256xf32, #tpu.memory_space<vmem>>, vector<8x256xf32>
    tpu.vector_store %arg11[%c8, %c0_29], %38 {strides = array<i32>} : memref<16x256xf32, #tpu.memory_space<vmem>>, vector<8x256xf32>,
    return
  }
  func.func @transform_0(%arg0: i32) -> (i32, i32) {
    %c0_i32 = arith.constant 0 : i32
    %c0_i32_0 = arith.constant 0 : i32
    %c0_i32_1 = arith.constant 0 : i32
    return %c0_i32, %c0_i32_0 : i32, i32
  }
  func.func @transform_1(%arg0: i32) -> (i32, i32) {
    %c0_i32 = arith.constant 0 : i32
    %c0_i32_0 = arith.constant 0 : i32
    %c0_i32_1 = arith.constant 0 : i32
    return %c0_i32, %c0_i32_0 : i32, i32
  }
  func.func @transform_2(%arg0: i32) -> (i32, i32) {
    %c0_i32 = arith.constant 0 : i32
    %c0_i32_0 = arith.constant 0 : i32
    %c0_i32_1 = arith.constant 0 : i32
    return %c0_i32, %c0_i32_0 : i32, i32
  }
  func.func @transform_3(%arg0: i32) -> (i32, i32) {
    %c0_i32 = arith.constant 0 : i32
    %c0_i32_0 = arith.constant 0 : i32
    %c0_i32_1 = arith.constant 0 : i32
    return %c0_i32, %c0_i32_0 : i32, i32
  }
  func.func @transform_4(%arg0: i32) -> (i32, i32) {
    %c0_i32 = arith.constant 0 : i32
    %c0_i32_0 = arith.constant 0 : i32
    %c0_i32_1 = arith.constant 0 : i32
    return %c0_i32, %c0_i32_0 : i32, i32
  }
  func.func @transform_5(%arg0: i32) -> (i32, i32) {
    %c0_i32 = arith.constant 0 : i32
    %c0_i32_0 = arith.constant 0 : i32
    %c0_i32_1 = arith.constant 0 : i32
    return %c0_i32, %c0_i32_0 : i32, i32
  }
  func.func @transform_6(%arg0: i32) -> (i32, i32) {
    %c0_i32 = arith.constant 0 : i32
    %c0_i32_0 = arith.constant 0 : i32
    %c0_i32_1 = arith.constant 0 : i32
    return %c0_i32, %c0_i32_0 : i32, i32
  }
  func.func @transform_7(%arg0: i32) -> (i32, i32) {
    %c0_i32 = arith.constant 0 : i32
    %c0_i32_0 = arith.constant 0 : i32
    %c0_i32_1 = arith.constant 0 : i32
    return %c0_i32, %c0_i32_0 : i32, i32
  }
  func.func @transform_8(%arg0: i32) -> (i32, i32) {
    %c0_i32 = arith.constant 0 : i32
    %c0_i32_0 = arith.constant 0 : i32
    %c0_i32_1 = arith.constant 0 : i32
    return %c0_i32, %c0_i32_0 : i32, i32
  }
  func.func @transform_9(%arg0: i32) -> (i32, i32) {
    %c0_i32 = arith.constant 0 : i32
    %c0_i32_0 = arith.constant 0 : i32
    %c0_i32_1 = arith.constant 0 : i32
    return %c0_i32, %c0_i32_0 : i32, i32
  }
  func.func @transform_10(%arg0: i32) -> (i32, i32) {
    %c0_i32 = arith.constant 0 : i32
    %c0_i32_0 = arith.constant 0 : i32
    %c0_i32_1 = arith.constant 0 : i32
    return %c0_i32, %c0_i32_0 : i32, i32
  }
}

</mosaic_0001>

<bundles_post_ra>
// kernel: rmdetr_forward.1
= control target key start
LH: loop header
LB: loop body
LE: loop exit
PB: predicated region body
PF: predicated region fallthrough
CT: control target
= control target key end

     0   :  { %v843_v1 = vmov 0   ;;  %vm146_vm0 = vcmask 392192   ;;  %v844_v13 = vmov 0.0   ;;  %vm845_vm1 = vmmov 0   ;;  %s1072_s0 = inlined_call_operand.vmem [shape: bf16[48,512], index: 0, kind: input, shape index: {}]   ;;  %s1073_s2 = inlined_call_operand.vmem [shape: bf16[32,48], index: 2, kind: input, shape index: {}]   ;;  %s1074_s4 = inlined_call_operand.vmem [shape: bf16[32,128], index: 4, kind: input, shape index: {}]   ;;  %s1075_s3 = inlined_call_operand.vmem [shape: f32[32,1], index: 3, kind: input, shape index: {}]   ;;  %s1076_s1 = inlined_call_operand.vmem [shape: bf16[16,32], index: 1, kind: input, shape index: {}]   ;;  %s1077_s6 = inlined_call_operand.vmem [shape: bf16[128,128], index: 6, kind: input, shape index: {}]   ;;  %s1078_s8 = inlined_call_operand.vmem [shape: bf16[128,32], index: 8, kind: input, shape index: {}]   ;;  %s1079_s5 = inlined_call_operand.vmem [shape: f32[1,128], index: 5, kind: input, shape index: {}, may-alias: {5,7}]   ;;  %s1080_s7 = inlined_call_operand.vmem [shape: f32[1,128], index: 7, kind: input, shape index: {}, may-alias: {5,7}]   ;;  %s1081_s9 = inlined_call_operand.vmem [shape: f32[1,32], index: 9, kind: input, shape index: {}]   ;;  %s1082_s10 = inlined_call_operand.vmem [shape: f32[16,256], index: 10, kind: output, shape index: {}]  }
   0x1   :  { %v804_v0 = vld [vmem:[%s1072_s0 + $0x4] ss:$16 sps:$4 sm:$0xff]   ;;  %185 = vmatprep.mubr.bf16.mxu0 %v843_v1  ;;  %802 = vset.pattern.permute.xlu0 %v843_v1  ;;  %v806_v2 = vld [vmem:[%s1072_s0] ss:$16 sps:$4 sm:$0xff]   ;;  %v53_v11 = vld [vmem:[%s1075_s3 + $0x8] sm:$0xff]  ;;  %vm313_vm2 = vcmask 261120  }
   0x2   :  { %803 = vset.pattern.permute.xlu1 %v843_v1  ;;  %238 = vmatprep.mubr.bf16.mxu1 %v843_v1  ;;  %v807_v3 = vld [vmem:[%s1072_s0 + $0x24] ss:$16 sps:$4 sm:$0xff]   ;;  %v809_v4 = vld [vmem:[%s1072_s0 + $0x20] ss:$16 sps:$4 sm:$0xff]   ;;  %v818_v12 = vld [vmem:[%s1072_s0 + $0xc] ss:$16 sps:$4 sm:$0xff]  }
   0x3   :  { %153 = vmatprep.subr.bf16.mxu0 %v804_v0  ;;  %v810_v5 = vld [vmem:[%s1072_s0 + $0x44] ss:$16 sps:$4 sm:$0xff]   ;;  %v812_v6 = vld [vmem:[%s1072_s0 + $0x40] ss:$16 sps:$4 sm:$0xff]   ;;  %v55_v14 = vld [vmem:[%s1075_s3 + $0x18] sm:$0xff]  ;;  %206 = vmatprep.subr.bf16.mxu1 %v818_v12 }
   0x4   :  { %154 = vmatpush1.bf16.msra.mxu0 %v806_v2  ;;  %v813_v7 = vld [vmem:[%s1073_s2] sm:$0xff]   ;;  %v54_v9 = vld [vmem:[%s1075_s3 + $0x10] sm:$0xff]  ;;  %v820_v15 = vld [vmem:[%s1072_s0 + $0x8] ss:$16 sps:$4 sm:$0xff]  }
   0x5   :  { %155 = vmatprep.subr.bf16.mxu0 %v807_v3  ;;  %v52_v8 = vld [vmem:[%s1075_s3] sm:$0xff]  ;;  %68 = vperm.xlu1 %803, %v54_v9   ;;  %v821_v16 = vld [vmem:[%s1072_s0 + $0x2c] ss:$16 sps:$4 sm:$0xff]   ;;  %v823_v19 = vld [vmem:[%s1072_s0 + $0x28] ss:$16 sps:$4 sm:$0xff]  }
   0x6   :  { %v814_v10 = vld [vmem:[%s1074_s4] sm:$0xff]   ;;  %58 = vperm.xlu0 %802, %v52_v8   ;;  %v816_v17 = vld [vmem:[%s1074_s4 + $0x8] sm:$0xff]   ;;  %207 = vmatpush1.bf16.msra.mxu1 %v820_v15  ;;  %v829_v25 = vld [vmem:[%s1077_s6 + $0x10] sm:$0xff]  }
   0x7   :  { %v815_v18 = vld [vmem:[%s1073_s2 + $0x8] sm:$0xff]   ;;  %208 = vmatprep.subr.bf16.mxu1 %v821_v16  ;;  %v827_v22 = vld [vmem:[%s1077_s6] sm:$0xff]   ;;  %v830_v26 = vld [vmem:[%s1077_s6 + $0x18] sm:$0xff]  }
   0x8   :  { %156 = vmatpush1.bf16.msra.mxu0 %v809_v4  ;;  %v824_v20 = vld [vmem:[%s1072_s0 + $0x4c] ss:$16 sps:$4 sm:$0xff]   ;;  %v826_v21 = vld [vmem:[%s1072_s0 + $0x48] ss:$16 sps:$4 sm:$0xff]   ;;  %v817_v23 = vld [vmem:[%s1076_s1] sm:$0xff]  }
   0x9   :  { %157 = vmatprep.subr.bf16.mxu0 %v810_v5  ;;  %73 = vperm.xlu1 %803, %v55_v14   ;;  %v828_v24 = vld [vmem:[%s1077_s6 + $0x8] sm:$0xff]   ;;  %v831_v27 = vld [vmem:[%s1077_s6 + $0x20] sm:$0xff]   ;;  %v833_v29 = vld [vmem:[%s1077_s6 + $0x30] sm:$0xff]  }
   0xa   :  { %63 = vperm.xlu0 %802, %v53_v11   ;;  %209 = vmatpush1.bf16.msra.mxu1 %v823_v19  ;;  %v832_v28 = vld [vmem:[%s1077_s6 + $0x28] sm:$0xff]   ;;  %v834_v30 = vld [vmem:[%s1077_s6 + $0x38] sm:$0xff]   ;;  %v835_v31 = vld [vmem:[%s1078_s8] sm:$0xff]  }
   0xb   :  { %210 = vmatprep.subr.bf16.mxu1 %v824_v20  ;;  %v836_v32 = vld [vmem:[%s1078_s8 + $0x8] sm:$0xff]   ;;  %v837_v33 = vld [vmem:[%s1078_s8 + $0x10] sm:$0xff]   ;;  %v838_v34 = vld [vmem:[%s1078_s8 + $0x18] sm:$0xff]  }
   0xc   :  { %158 = vmatpush1.bf16.msra.mxu0 %v812_v6  ;;  %v839_v35 = vld [vmem:[%s1078_s8 + $0x20] sm:$0xff]   ;;  %v840_v36 = vld [vmem:[%s1078_s8 + $0x28] sm:$0xff]  }
   0xd   :  { %751 = vmatprep.subr.bf16.mxu0 %v844_v13  ;;  %v705_v4 = vld [vmem:[%s1079_s5] ss:$0 sm:$0xff] }
   0xe   :  { %211 = vmatpush1.bf16.msra.mxu1 %v826_v21 }
   0xf   :  { %701 = vmatmul.mubr.msk.bf16.vlgmr.msra.gmra.mrb[0].mxu0 %vm146_vm0, %v813_v7  ;;  %759 = vmatprep.subr.bf16.mxu1 %v844_v13 }
  0x10   :  { %752 = vmatpush3.bf16.msra.mxu0 %v814_v10  ;;  %195 = vmatprep.mubr.bf16.mxu0 %v843_v1 }
  0x11   :  { %753 = vmatprep.subr.bf16.mxu0 %v844_v13  ;;  %703 = vmatmul.mubr.msk.bf16.vlgmr.msra.gmra.mrb[0].mxu1 %vm146_vm0, %v813_v7 }
  0x12   :  { %760 = vmatpush3.bf16.msra.mxu1 %v827_v22  ;;  %248 = vmatprep.mubr.bf16.mxu1 %v843_v1 }
  0x13   :  { %761 = vmatprep.subr.bf16.mxu1 %v844_v13 }
  0x14   :  { %754 = vmatpush3.bf16.msra.mxu0 %v816_v17 }
  0x15   :  { %779 = vmatprep.subr.bf16.mxu0 %v844_v13 }
  0x16   :  { %762 = vmatpush3.bf16.msra.mxu1 %v828_v24 }
  0x17   :  { %702 = vmatmul.mubr.msk.bf16.gmra.mrb[4].mxu0 %vm146_vm0, %v815_v18  ;;  %763 = vmatprep.subr.bf16.mxu1 %v844_v13 }
  0x18   :  { %755 = vmatprep.mubr.msk.bf16.mxu0 %vm845_vm1, %v844_v13 }
  0x19   :  { %704 = vmatmul.mubr.msk.bf16.gmra.mrb[4].mxu1 %vm146_vm0, %v815_v18 }
  0x1a   :  { %764 = vmatpush3.bf16.msra.mxu1 %v829_v25  ;;  %775 = vmatprep.mubr.msk.bf16.mxu1 %vm845_vm1, %v844_v13 }
  0x1b   :  { %765 = vmatprep.subr.bf16.mxu1 %v844_v13 }
  0x1e   :  { %766 = vmatpush3.bf16.msra.mxu1 %v830_v26 }
  0x1f   :  { %756 = vmatmul.mubr.msk.bf16.vlgmr.msra.gmra.mrb[8].mxu0 %vm313_vm2, %v817_v23  ;;  %767 = vmatprep.subr.bf16.mxu1 %v844_v13 }
  0x20   :  { %795 = vmatprep.mubr.msk.bf16.mxu0 %vm845_vm1, %v844_v13  ;;  %780 = vmatpush3.bf16.msra.mxu0 %v835_v31 }
  0x21   :  { %781 = vmatprep.subr.bf16.mxu0 %v844_v13 }
  0x22   :  { %768 = vmatpush3.bf16.msra.mxu1 %v831_v27 }
  0x23   :  { %769 = vmatprep.subr.bf16.mxu1 %v844_v13 }
  0x24   :  { %782 = vmatpush3.bf16.msra.mxu0 %v836_v32 }
  0x25   :  { %783 = vmatprep.subr.bf16.mxu0 %v844_v13 }
  0x26   :  { %770 = vmatpush3.bf16.msra.mxu1 %v832_v28 }
  0x27   :  { %771 = vmatprep.subr.bf16.mxu1 %v844_v13 }
  0x28   :  { %784 = vmatpush3.bf16.msra.mxu0 %v837_v33 }
  0x29   :  { %785 = vmatprep.subr.bf16.mxu0 %v844_v13 }
  0x2a   :  { %772 = vmatpush3.bf16.msra.mxu1 %v833_v29 }
  0x2b   :  { %773 = vmatprep.subr.bf16.mxu1 %v844_v13 }
  0x2c   :  { %786 = vmatpush3.bf16.msra.mxu0 %v838_v34 }
  0x2d   :  { %787 = vmatprep.subr.bf16.mxu0 %v844_v13 }
  0x2e   :  { %774 = vmatpush3.bf16.msra.mxu1 %v834_v30 }
  0x30   :  { %788 = vmatpush3.bf16.msra.mxu0 %v839_v35 }
  0x31   :  { %789 = vmatprep.subr.bf16.mxu0 %v844_v13 }
  0x34   :  { %790 = vmatpush3.bf16.msra.mxu0 %v840_v36 }
  0x35   :  { %791 = vmatprep.subr.bf16.mxu0 %v844_v13 }
  0x84   :  { %v69_v44 = vpop.permute.xlu1 %68 }
  0x85   :  { %v59_v37 = vpop.permute.xlu0 %58 }
  0x88   :  { %v74_v55 = vpop.permute.xlu1 %73 }
  0x89   :  { %v64_v39 = vpop.permute.xlu0 %63 }
  0xe2   :  { %v187_v38 = vpop.f32.mrb[0].mxu0 }
  0xe3   :  { %v188_v40 = vadd.f32 %v187_v38, %v59_v37  ;;  %v189_v41 = vpop.f32.mrb[1].mxu0 }
  0xe4   :  { %v190_v42 = vadd.f32 %v189_v41, %v59_v37  ;;  %v191_v43 = vpop.f32.mrb[2].mxu0  ;;  %v240_v5 = vpop.f32.mrb[0].mxu1 }
  0xe5   :  { %v192_v45 = vadd.f32 %v191_v43, %v64_v39  ;;  %v193_v46 = vpop.f32.mrb[3].mxu0  ;;  %v259_v48 = vmax.f32 %v188_v40, 0.0  ;;  %v241_v7 = vadd.f32 %v240_v5, %v59_v37  ;;  %v242_v8 = vpop.f32.mrb[1].mxu1 }
  0xe6   :  { %v194_v47 = vadd.f32 %v193_v46, %v64_v39  ;;  %v260_v50 = vmax.f32 %v190_v42, 0.0  ;;  %v243_v11 = vadd.f32 %v242_v8, %v59_v37  ;;  %v244_v12 = vpop.f32.mrb[2].mxu1  ;;  %v842_v46 = vld [vmem:[%s1078_s8 + $0x38] sm:$0xff]  }
  0xe7   :  { %v263_v49 = vmax.f32 %v192_v45, 0.0  ;;  %v261_v16 = vmax.f32 %v241_v7, 0.0  ;;  %v245_v17 = vadd.f32 %v244_v12, %v64_v39  ;;  %v246_v18 = vpop.f32.mrb[3].mxu1 }
  0xe8   :  { %v264_v51 = vmax.f32 %v194_v47, 0.0  ;;  %v262_v20 = vmax.f32 %v243_v11, 0.0  ;;  %v247_v21 = vadd.f32 %v246_v18, %v64_v39  ;;  %v710_v47 = vld [vmem:[%s1080_s7] ss:$0 sm:$0xff] }
  0xe9   :  { %v275_v52 = vpack.c.bf16 %v263_v49, %v259_v48  ;;  %v265_v24 = vmax.f32 %v245_v17, 0.0 }
  0xea   :  { %v276_v53 = vpack.c.bf16 %v264_v51, %v260_v50  ;;  %v197_v54 = vpop.f32.mrb[4].mxu0  ;;  %v266_v25 = vmax.f32 %v247_v21, 0.0 }
  0xeb   :  { %v198_v56 = vadd.f32 %v197_v54, %v69_v44  ;;  %v199_v57 = vpop.f32.mrb[5].mxu0  ;;  %v277_v28 = vpack.c.bf16 %v265_v24, %v261_v16 }
  0xec   :  { %v200_v58 = vadd.f32 %v199_v57, %v69_v44  ;;  %v201_v59 = vpop.f32.mrb[6].mxu0  ;;  %592 = vmatprep.subr.bf16.mxu1 %v276_v53  ;;  %v278_v29 = vpack.c.bf16 %v266_v25, %v262_v20  ;;  %v250_v30 = vpop.f32.mrb[4].mxu1 }
  0xed   :  { %v202_v60 = vadd.f32 %v201_v59, %v74_v55  ;;  %v203_v61 = vpop.f32.mrb[7].mxu0  ;;  %v267_v63 = vmax.f32 %v198_v56, 0.0  ;;  %v251_v32 = vadd.f32 %v250_v30, %v69_v44  ;;  %v252_v33 = vpop.f32.mrb[5].mxu1 }
  0xee   :  { %v204_v62 = vadd.f32 %v203_v61, %v74_v55  ;;  %v268_v2 = vmax.f32 %v200_v58, 0.0  ;;  %v253_v34 = vadd.f32 %v252_v33, %v69_v44  ;;  %v254_v35 = vpop.f32.mrb[6].mxu1  ;;  %v841_v44 = vld [vmem:[%s1078_s8 + $0x30] sm:$0xff]  }
  0xef   :  { %v271_v0 = vmax.f32 %v202_v60, 0.0  ;;  %v269_v36 = vmax.f32 %v251_v32, 0.0  ;;  %v255_v37 = vadd.f32 %v254_v35, %v74_v55  ;;  %v256_v38 = vpop.f32.mrb[7].mxu1  ;;  %792 = vmatpush3.bf16.msra.mxu0 %v841_v44 }
  0xf0   :  { %v272_v3 = vmax.f32 %v204_v62, 0.0  ;;  %v270_v39 = vmax.f32 %v253_v34, 0.0  ;;  %v257_v40 = vadd.f32 %v256_v38, %v74_v55  ;;  %793 = vmatprep.subr.bf16.mxu0 %v844_v13  ;;  %v719_v13 = vld [vmem:[%s1081_s9] ss:$0 sm:$0xff] }
  0xf1   :  { %v279_v6 = vpack.c.bf16 %v271_v0, %v267_v63  ;;  %v273_v41 = vmax.f32 %v255_v37, 0.0 }
  0xf2   :  { %v280_v9 = vpack.c.bf16 %v272_v3, %v268_v2  ;;  %v351_v10 = vpop.f32.mrb[8].mxu0  ;;  %v274_v42 = vmax.f32 %v257_v40, 0.0 }
  0xf3   :  { %v352_v14 = vadd.f32 %v705_v4, %v351_v10  ;;  %v757_v15 = vpop.f32.mrb[9].mxu0  ;;  %v281_v43 = vpack.c.bf16 %v273_v41, %v269_v36  ;;  %794 = vmatpush3.bf16.msra.mxu0 %v842_v46 }
  0xf4   :  { %v354_v19 = vpop.f32.mrb[10].mxu0  ;;  %v282_v45 = vpack.c.bf16 %v274_v42, %v270_v39 }
  0xf5   :  { %v355_v22 = vadd.f32 %v705_v4, %v354_v19  ;;  %v758_v23 = vpop.f32.mrb[11].mxu0  ;;  %v358_v26 = vmax.f32 %v352_v14, 0.0 }
  0xf7   :  { %v359_v27 = vmax.f32 %v355_v22, 0.0 }
  0xf9   :  { %v360_v31 = vpack.c.bf16 %v359_v27, %v358_v26 }
  0xfb   :  { %776 = vmatmul.mubr.bf16.vlgmr.msra.gmra.mrb[8].mxu1 %v360_v31 }
  0xfc   :  { %593 = vmatpush1.bf16.msra.mxu1 %v275_v52  ;;  %624 = vmatprep.mubr.bf16.mxu1 %v843_v1 }
  0xfd   :  { %594 = vmatprep.subr.bf16.mxu1 %v280_v9 }
 0x100   :  { %595 = vmatpush1.bf16.msra.mxu1 %v279_v6 }
 0x101   :  { %640 = vmatprep.subr.bf16.mxu1 %v278_v29 }
 0x1ce   :  { %v466_v48 = vpop.f32.mrb[8].mxu1 }
 0x1cf   :  { %v467_v49 = vadd.f32 %v710_v47, %v466_v48  ;;  %v777_v50 = vpop.f32.mrb[9].mxu1 }
 0x1d0   :  { %v469_v51 = vpop.f32.mrb[10].mxu1 }
 0x1d1   :  { %v470_v52 = vadd.f32 %v710_v47, %v469_v51  ;;  %v778_v53 = vpop.f32.mrb[11].mxu1  ;;  %v473_v54 = vmax.f32 %v467_v49, 0.0 }
 0x1d3   :  { %v474_v55 = vmax.f32 %v470_v52, 0.0 }
 0x1d5   :  { %v475_v56 = vpack.c.bf16 %v474_v55, %v473_v54 }
 0x1d7   :  { %796 = vmatmul.mubr.bf16.vlgmr.msra.gmra.mrb[12].mxu0 %v475_v56 }
 0x2aa   :  { %v581_v57 = vpop.f32.mrb[12].mxu0 }
 0x2ab   :  { %v797_v58 = vpop.f32.mrb[13].mxu0  ;;  %v582_v60 = vadd.f32 %v719_v13, %v581_v57 }
 0x2ac   :  { %v584_v59 = vpop.f32.mrb[14].mxu0 }
 0x2ad   :  { %v585_v61 = vadd.f32 %v719_v13, %v584_v59  ;;  %v798_v62 = vpop.f32.mrb[15].mxu0 }
 0x2af   :  { %v588_v63 = vpack.c.bf16 %v585_v61, %v582_v60 }
 0x2b1   :  { %728 = vmatmul.mubr.msk.bf16.vlgmr.msra.gmra.mrb[12].mxu1 %vm313_vm2, %v588_v63  ;;  %v636_v0 = vrot.slane %v588_v63, 4 }
 0x2b2   :  { %641 = vmatpush1.bf16.msra.mxu1 %v277_v28  ;;  %672 = vmatprep.mubr.bf16.mxu1 %v843_v1 }
 0x2b3   :  { %642 = vmatprep.subr.bf16.mxu1 %v282_v45 }
 0x2b6   :  { %643 = vmatpush1.bf16.msra.mxu1 %v281_v43 }
 0x2b9   :  { %729 = vmatmul.mubr.msk.bf16.vlgmr.msra.gmra.mrb[16].mxu1 %vm313_vm2, %v636_v0 }
 0x384   :  { %v626_v2 = vpop.f32.mrb[12].mxu1 }
 0x385   :  { %633 = vst [vmem:[%s1082_s10] sm:$0xff] %v626_v2  ;;  %v628_v3 = vpop.f32.mrb[13].mxu1 }
 0x386   :  { %634 = vst [vmem:[%s1082_s10 + $0x8] sm:$0xff] %v628_v3  ;;  %v630_v4 = vpop.f32.mrb[14].mxu1 }
 0x387   :  { %v631_v5 = vpop.f32.mrb[15].mxu1 }
 0x38c   :  { %v674_v6 = vpop.f32.mrb[16].mxu1 }
 0x38d   :  { %681 = vst [vmem:[%s1082_s10 + $0x10] sm:$0xff] %v674_v6  ;;  %v676_v1 = vpop.f32.mrb[17].mxu1 }
 0x38e   :  { %682 = vst [vmem:[%s1082_s10 + $0x18] sm:$0xff] %v676_v1  ;;  %v678_v7 = vpop.f32.mrb[18].mxu1 }
 0x38f   :  { %v679_v8 = vpop.f32.mrb[19].mxu1 }

</bundles_post_ra>
